<compile_context>
chip_gen: v7x
topology: tpu7x:2x2x1
jax: 0.10.0
libtpu: 0.0.40
codegen_flags: <defaults>
</compile_context>

<pallas_src>
import math

import jax
import jax.numpy as jnp
from jax.experimental import pallas as pl
from jax.experimental.pallas import tpu as pltpu

LANE = 128


def _round_up(n, m):
  return (n + m - 1) // m * m


def _pick_batch_tile(batch, seq, row_cap=2048):
  """Largest batch tile that is a multiple of 8, divides batch, and keeps <= row_cap rows."""
  if batch % 8 != 0:
    return batch
  tb = batch
  while tb > 8 and tb % 2 == 0 and (tb // 2) % 8 == 0 and tb * seq > row_cap:
    tb //= 2
  return tb


# ----------------------------------------------------------------------------
# Pallas kernel (one batch tile per grid step)
# ----------------------------------------------------------------------------
def _srnn_kernel_factory(num_mid, seq_len, tile_batch, hyper_pad, gate_pad,
                         hidden_size, multihead, has_hidden, single_output):
  """Kernel body for a fixed static configuration."""

  def kernel(*refs):
    idx = 0
    x_ref = refs[idx]; idx += 1                            # (TB*S, I) bf16, batch-major rows
    wf_ref, bf_ref = refs[idx], refs[idx + 1]; idx += 2    # fused fc[0] (+ fc2 gate)
    mids = []
    for _ in range(num_mid):                               # middle fc linears
      mids.append((refs[idx], refs[idx + 1])); idx += 2
    wl_ref, bl_ref = refs[idx], refs[idx + 1]; idx += 2    # last fc linear (-> HID)
    we_ref, be_ref = refs[idx], refs[idx + 1]; idx += 2    # end_fc (128-lane padded)
    h0_ref = None
    if has_hidden:
      h0_ref = refs[idx]; idx += 1                         # (TB, HID) f32
    y_ref = refs[idx]; idx += 1                            # (TB*S or TB, 128) f32, lane-dense
    hid_ref = refs[idx]; idx += 1                          # (TB, HID) f32
    b_scr = refs[idx]; idx += 1                            # (TB*S, HID) f32 scratch
    outs_scr = None
    if not single_output:
      outs_scr = refs[idx]; idx += 1                       # (TB*S, HID) f32 scratch

    f32, bf16 = jnp.float32, jnp.bfloat16
    TB, S, HID = tile_batch, seq_len, hidden_size

    # --- fused first matmul on batch-major rows: fc[0] (padded hyper) [+ fc2 gate] ---
    fused = jnp.dot(x_ref[...], wf_ref[...],
                    preferred_element_type=f32) + bf_ref[...]      # (TB*S, HYP[+128])
    if multihead:
      gate = jax.nn.sigmoid(fused[:, hyper_pad:hyper_pad + gate_pad])  # full-lane tile
      h = jnp.maximum(fused[:, :hyper_pad], 0.0)
    else:
      gate = None
      h = jnp.maximum(fused, 0.0)

    # --- remaining fc stack: [Linear, ReLU]* then Linear(hyper -> hidden) ------------
    for (w_ref, b_ref) in mids:
      h = jnp.dot(h.astype(bf16), w_ref[...], preferred_element_type=f32) + b_ref[...]
      h = jnp.maximum(h, 0.0)
    b = jnp.dot(h.astype(bf16), wl_ref[...], preferred_element_type=f32) + bl_ref[...]
    if multihead:
      b = b * gate[:, :HID]                                        # (TB*S, HID) f32
    b_scr[...] = b                                                 # batch-major rows

    # --- recurrence: out_i = relu(b[:, i] + roll(out_{i-1}, 1, -1)), f32 --------------
    # TODO(synk): switch the static unroll to lax.fori_loop(unroll=True) for large S.
    prev = None
    for i in range(S):
      cur = b_scr[pl.ds(i, TB, stride=S), :]                       # step-i rows (strided)
      if i == 0:
        if has_hidden:
          cur = cur + pltpu.roll(h0_ref[...], 1, 1)                # torch.roll(hidden,1,-1)
      else:
        cur = cur + pltpu.roll(prev, 1, 1)
      prev = jnp.maximum(cur, 0.0)
      if not single_output:
        outs_scr[pl.ds(i, TB, stride=S), :] = prev                 # batch-major scatter

    hid_ref[...] = prev                                            # outputs[:, -1, :]

    # --- end_fc on a batch-major slab (lane-dense 128-wide output) --------------------
    if single_output:
      y_ref[...] = jnp.dot(prev.astype(bf16), we_ref[...],
                           preferred_element_type=f32) + be_ref[...]
    else:
      y_ref[...] = jnp.dot(outs_scr[...].astype(bf16), we_ref[...],
                           preferred_element_type=f32) + be_ref[...]

  return kernel


# ----------------------------------------------------------------------------
# One-time parameter preparation (padding / fusion / bf16 weight cast)
# ----------------------------------------------------------------------------
def prepare_srnn_params(params, *, multihead=True):
  fc = params["fc"]
  input_size = fc[0][0].shape[0]
  hyper = fc[0][0].shape[1]
  hidden = fc[-1][0].shape[1]
  out = params["end"][0].shape[1]
  hyp_p = _round_up(max(hyper, 1), LANE)
  out_p = _round_up(max(out, 1), LANE)
  gate_p = _round_up(max(hidden, 1), LANE) if multihead else 0

  padc = lambda w, n: jnp.pad(w, ((0, 0), (0, n - w.shape[1])))
  padr = lambda w, n: jnp.pad(w, ((0, n - w.shape[0]), (0, 0)))
  padv = lambda b, n: jnp.pad(b, (0, n - b.shape[0]))

  w0, b0 = fc[0]
  w0p, b0p = padc(w0, hyp_p), padv(b0, hyp_p)
  if multihead:
    w2, b2 = params["fc2"]
    w_first = jnp.concatenate([w0p, padc(w2, gate_p)], axis=1)   # (I, HYP_p + 128)
    b_first = jnp.concatenate([b0p, padv(b2, gate_p)], axis=0)
  else:
    w_first, b_first = w0p, b0p

  mids = []
  for (w, b) in fc[1:-1]:
    mids.append((padr(padc(w, hyp_p), hyp_p).astype(jnp.bfloat16),
                 padv(b, hyp_p).reshape(1, -1).astype(jnp.float32)))

  wl, bl = fc[-1]
  we, be = params["end"]

  return dict(
      sizes=dict(input=input_size, hyper_pad=hyp_p, gate_pad=gate_p,
                 hidden=hidden, out=out, out_pad=out_p),
      multihead=multihead,
      w_first=w_first.astype(jnp.bfloat16),
      b_first=b_first.reshape(1, -1).astype(jnp.float32),
      mids=mids,
      w_last=padr(wl, hyp_p).astype(jnp.bfloat16),
      b_last=bl.reshape(1, -1).astype(jnp.float32),
      w_end=padc(we, out_p).astype(jnp.bfloat16),
      b_end=padv(be, out_p).reshape(1, -1).astype(jnp.float32),
  )


# ----------------------------------------------------------------------------
# Forward wrapper
# ----------------------------------------------------------------------------
def srnn_forward(x, prepared, hidden=None, *, single_output=False):
  """Pallas SRNN.forward (embedding=False). x: (B,S,I) f32; hidden: optional (B,HID)."""
  B, S, I = x.shape
  sz = prepared["sizes"]
  HID, HYP, GATEP = sz["hidden"], sz["hyper_pad"], sz["gate_pad"]
  OUT, OUTP = sz["out"], sz["out_pad"]
  multihead = prepared["multihead"]
  has_hidden = hidden is not None

  TB = _pick_batch_tile(B, S)
  n_tiles = B // TB
  RT = TB * S

  # x only ever feeds the MXU as bf16: cast once in the wrapper (halves its DMA).
  x_bm = x.reshape(B * S, I).astype(jnp.bfloat16)     # free reshape, batch-major rows

  full2d = lambda arr: pl.BlockSpec(arr.shape, lambda i: (0, 0))

  flat = [x_bm, prepared["w_first"], prepared["b_first"]]
  in_specs = [pl.BlockSpec((RT, I), lambda i: (i, 0)),
              full2d(prepared["w_first"]), full2d(prepared["b_first"])]
  for (w, b) in prepared["mids"]:
    flat += [w, b]
    in_specs += [full2d(w), full2d(b)]
  flat += [prepared["w_last"], prepared["b_last"],
           prepared["w_end"], prepared["b_end"]]
  in_specs += [full2d(prepared["w_last"]), full2d(prepared["b_last"]),
               full2d(prepared["w_end"]), full2d(prepared["b_end"])]
  if has_hidden:
    flat.append(hidden)
    in_specs.append(pl.BlockSpec((TB, HID), lambda i: (i, 0)))

  out_rows_tile = TB if single_output else RT
  out_rows = B if single_output else B * S
  out_shape = (jax.ShapeDtypeStruct((out_rows, OUTP), jnp.float32),
               jax.ShapeDtypeStruct((B, HID), jnp.float32))
  out_specs = (pl.BlockSpec((out_rows_tile, OUTP), lambda i: (i, 0)),
               pl.BlockSpec((TB, HID), lambda i: (i, 0)))

  scratch_shapes = [pltpu.VMEM((RT, HID), jnp.float32)]          # b (fc-stack output)
  if not single_output:
    scratch_shapes.append(pltpu.VMEM((RT, HID), jnp.float32))    # recurrence states

  kernel = _srnn_kernel_factory(
      num_mid=len(prepared["mids"]), seq_len=S, tile_batch=TB, hyper_pad=HYP,
      gate_pad=GATEP, hidden_size=HID, multihead=multihead,
      has_hidden=has_hidden, single_output=single_output)

  y, hid = pl.pallas_call(
      kernel,
      out_shape=out_shape,
      grid=(n_tiles,),
      in_specs=in_specs,
      out_specs=out_specs,
      scratch_shapes=scratch_shapes,
      compiler_params=pltpu.CompilerParams(
          dimension_semantics=("parallel",),
          vmem_limit_bytes=32 * 1024 * 1024),
  )(*flat)

  if single_output:
    outputs = y[:, :OUT].reshape(B, 1, OUT)
  else:
    outputs = y.reshape(B, S, OUTP)[:, :, :OUT]       # free reshape + lane slice
  return outputs, hid


# ----------------------------------------------------------------------------
# Pure-JAX reference (mirrors the PyTorch forward; matmul_dtype lets us match the
# kernel's intentional bf16-operand / f32-accumulate MXU numerics)
# ----------------------------------------------------------------------------
def srnn_reference(x, params, hidden=None, *, multihead=True, single_output=False,
                   matmul_dtype=jnp.float32):
  f32 = jnp.float32
  hp = jax.lax.Precision.HIGHEST

  def mm(a, w):
    return jnp.einsum("...i,io->...o", a.astype(matmul_dtype), w.astype(matmul_dtype),
                      precision=hp, preferred_element_type=f32)

  fc = params["fc"]
  h = x
  for li, (w, bias) in enumerate(fc):
    h = mm(h, w) + bias
    if li < len(fc) - 1:
      h = jnp.maximum(h, 0.0)
  b_act = h
  if multihead:
    w2, b2 = params["fc2"]
    b_act = b_act * jax.nn.sigmoid(mm(x, w2) + b2)
  S = x.shape[1]
  if hidden is not None:
    prev = jnp.maximum(b_act[:, 0] + jnp.roll(hidden, 1, axis=-1), 0.0)
  else:
    prev = jnp.maximum(b_act[:, 0], 0.0)
  outs = [prev]
  for i in range(1, S):
    prev = jnp.maximum(b_act[:, i] + jnp.roll(prev, 1, axis=-1), 0.0)
    outs.append(prev)
  outputs = jnp.stack(outs, axis=1)                 # (B, S, HID)
  hidden_out = outputs[:, -1, :]
  we, be = params["end"]
  y = mm(outputs, we) + be
  if single_output:
    y = y[:, -1:, :]
  return y, hidden_out


# ----------------------------------------------------------------------------
# Deterministic parameter init (nn.Linear defaults; weights stored as (in, out))
# ----------------------------------------------------------------------------
def _init_linear(key, fan_in, fan_out):
  kw, kb = jax.random.split(key)
  bound = 1.0 / math.sqrt(fan_in)
  w = jax.random.uniform(kw, (fan_in, fan_out), jnp.float32, -bound, bound)
  b = jax.random.uniform(kb, (fan_out,), jnp.float32, -bound, bound)
  return w, b


def init_srnn_params(key, input_size, output_size, hidden_size, num_layers,
                     hyper_size):
  keys = jax.random.split(key, num_layers + 3)
  fc = [_init_linear(keys[0], input_size, hyper_size)]
  for i in range(1, num_layers):
    fc.append(_init_linear(keys[i], hyper_size, hyper_size))
  fc.append(_init_linear(keys[num_layers], hyper_size, hidden_size))
  fc2 = _init_linear(keys[num_layers + 1], input_size, hidden_size)
  end = _init_linear(keys[num_layers + 2], hidden_size, output_size)
  return {"fc": fc, "fc2": fc2, "end": end}


# ----------------------------------------------------------------------------
if __name__ == "__main__":
  # SRNN(input_size=16, output_size=8, hidden_size=32, num_layers=2, hyper_size=64,
  #      embedding=False, single_output=False, multihead=True)
  B, S, I = 8, 8, 16
  HID, HY, OUT = 32, 64, 8
  NUM_LAYERS = 2

  key = jax.random.PRNGKey(0)
  k_par, k_x, k_h = jax.random.split(key, 3)
  params = init_srnn_params(k_par, I, OUT, HID, NUM_LAYERS, HY)
  x = jax.random.normal(k_x, (B, S, I), dtype=jnp.float32)
  hidden0 = jax.random.normal(k_h, (B, HID), dtype=jnp.float32)

  prepared = prepare_srnn_params(params, multihead=True)

  out, hid = srnn_forward(x, prepared, hidden0, single_output=False)
  out, hid = jax.block_until_ready((out, hid))
  assert out.shape == (B, S, OUT), out.shape
  assert hid.shape == (B, HID), hid.shape

  # Check against a reference with matched bf16-operand / f32-accumulate matmuls.
  ref_out, ref_hid = srnn_reference(x, params, hidden0, multihead=True,
                                    single_output=False, matmul_dtype=jnp.bfloat16)
  assert jnp.allclose(out, ref_out, atol=5e-3, rtol=5e-3), \
      float(jnp.max(jnp.abs(out - ref_out)))
  assert jnp.allclose(hid, ref_hid, atol=5e-3, rtol=5e-3), \
      float(jnp.max(jnp.abs(hid - ref_hid)))

  # Sanity vs full-f32 reference (bf16 MXU operands => loose tolerance expected).
  f32_out, f32_hid = srnn_reference(x, params, hidden0, multihead=True,
                                    single_output=False, matmul_dtype=jnp.float32)
  assert jnp.allclose(out, f32_out, atol=1e-1, rtol=1e-1), \
      float(jnp.max(jnp.abs(out - f32_out)))
  assert jnp.allclose(hid, f32_hid, atol=1e-1, rtol=1e-1), \
      float(jnp.max(jnp.abs(hid - f32_hid)))

  # Also exercise the single_output fast path (end_fc on final state only).
  out1, hid1 = srnn_forward(x, prepared, hidden0, single_output=True)
  out1, hid1 = jax.block_until_ready((out1, hid1))
  ref1, _ = srnn_reference(x, params, hidden0, multihead=True,
                           single_output=True, matmul_dtype=jnp.bfloat16)
  assert out1.shape == (B, 1, OUT), out1.shape
  assert jnp.allclose(out1, ref1, atol=5e-3, rtol=5e-3), \
      float(jnp.max(jnp.abs(out1 - ref1)))

  print("KERNEL_OK")
</pallas_src>

<mosaic_0001>
module attributes {stable_mosaic.version = 11 : i64} {
  func.func @kernel(%arg0: i32, %arg1: memref<64x16xbf16, #tpu.memory_space<vmem>>, %arg2: memref<16x256xbf16, #tpu.memory_space<vmem>>, %arg3: memref<1x256xf32, #tpu.memory_space<vmem>>, %arg4: memref<128x128xbf16, #tpu.memory_space<vmem>>, %arg5: memref<1x128xf32, #tpu.memory_space<vmem>>, %arg6: memref<128x32xbf16, #tpu.memory_space<vmem>>, %arg7: memref<1x32xf32, #tpu.memory_space<vmem>>, %arg8: memref<32x128xbf16, #tpu.memory_space<vmem>>, %arg9: memref<1x128xf32, #tpu.memory_space<vmem>>, %arg10: memref<8x32xf32, #tpu.memory_space<vmem>>, %arg11: memref<64x128xf32, #tpu.memory_space<vmem>>, %arg12: memref<8x32xf32, #tpu.memory_space<vmem>>, %arg13: memref<64x32xf32, #tpu.memory_space<vmem>>, %arg14: memref<64x32xf32, #tpu.memory_space<vmem>>) attributes {dimension_semantics = [#tpu.dimension_semantics<parallel>], iteration_bounds = array<i64: 1>, scalar_prefetch = 0 : i64, scratch_operands = 2 : i64, tpu.core_type = #tpu.core_type<tc>, window_params = [{transform_indices = @transform_0, window_bounds = array<i64: 64, 16>}, {pipeline_mode = #tpu.pipeline_mode<synchronous>, transform_indices = @transform_1, window_bounds = array<i64: 16, 256>}, {pipeline_mode = #tpu.pipeline_mode<synchronous>, transform_indices = @transform_2, window_bounds = array<i64: 1, 256>}, {pipeline_mode = #tpu.pipeline_mode<synchronous>, transform_indices = @transform_3, window_bounds = array<i64: 128, 128>}, {pipeline_mode = #tpu.pipeline_mode<synchronous>, transform_indices = @transform_4, window_bounds = array<i64: 1, 128>}, {pipeline_mode = #tpu.pipeline_mode<synchronous>, transform_indices = @transform_5, window_bounds = array<i64: 128, 32>}, {pipeline_mode = #tpu.pipeline_mode<synchronous>, transform_indices = @transform_6, window_bounds = array<i64: 1, 32>}, {pipeline_mode = #tpu.pipeline_mode<synchronous>, transform_indices = @transform_7, window_bounds = array<i64: 32, 128>}, {pipeline_mode = #tpu.pipeline_mode<synchronous>, transform_indices = @transform_8, window_bounds = array<i64: 1, 128>}, {transform_indices = @transform_9, window_bounds = array<i64: 8, 32>}, {transform_indices = @transform_10, window_bounds = array<i64: 64, 128>}, {transform_indices = @transform_11, window_bounds = array<i64: 8, 32>}]} {
    %c0 = arith.constant 0 : index
    %c0_0 = arith.constant 0 : index
    %0 = vector.load %arg1[%c0, %c0_0] : memref<64x16xbf16, #tpu.memory_space<vmem>>, vector<64x16xbf16>
    %c0_1 = arith.constant 0 : index
    %c0_2 = arith.constant 0 : index
    %1 = vector.load %arg2[%c0_1, %c0_2] : memref<16x256xbf16, #tpu.memory_space<vmem>>, vector<16x256xbf16>
    %cst = arith.constant dense<0.000000e+00> : vector<64x256xf32>
    %2 = tpu.matmul %0, %1, %cst {dimension_numbers = #tpu.dot_dimension_numbers<[1], [0], [0], [1], [0, 0, 1, 1], [], []>} : vector<64x16xbf16>, vector<16x256xbf16>, vector<64x256xf32> -> vector<64x256xf32>
    %c0_3 = arith.constant 0 : index
    %c0_4 = arith.constant 0 : index
    %3 = vector.load %arg3[%c0_3, %c0_4] : memref<1x256xf32, #tpu.memory_space<vmem>>, vector<1x256xf32>
    %4 = vector.broadcast %3 : vector<1x256xf32> to vector<64x256xf32>
    %5 = arith.addf %2, %4 : vector<64x256xf32>
    %6 = vector.extract_strided_slice %5 {offsets = [0, 128], sizes = [64, 128], strides = [1, 1]} : vector<64x256xf32> to vector<64x128xf32>
    %7 = arith.negf %6 : vector<64x128xf32>
    %8 = math.exp %7 : vector<64x128xf32>
    %cst_5 = arith.constant 1.000000e+00 : f32
    %9 = vector.broadcast %cst_5 : f32 to vector<64x128xf32>
    %10 = arith.addf %9, %8 : vector<64x128xf32>
    %11 = arith.divf %9, %10 : vector<64x128xf32>
    %12 = vector.extract_strided_slice %5 {offsets = [0, 0], sizes = [64, 128], strides = [1, 1]} : vector<64x256xf32> to vector<64x128xf32>
    %cst_6 = arith.constant 0.000000e+00 : f32
    %13 = vector.broadcast %cst_6 : f32 to vector<64x128xf32>
    %14 = arith.maximumf %12, %13 : vector<64x128xf32>
    %15 = arith.truncf %14 : vector<64x128xf32> to vector<64x128xbf16>
    %c0_7 = arith.constant 0 : index
    %c0_8 = arith.constant 0 : index
    %16 = vector.load %arg4[%c0_7, %c0_8] : memref<128x128xbf16, #tpu.memory_space<vmem>>, vector<128x128xbf16>
    %cst_9 = arith.constant dense<0.000000e+00> : vector<64x128xf32>
    %17 = tpu.matmul %15, %16, %cst_9 {dimension_numbers = #tpu.dot_dimension_numbers<[1], [0], [0], [1], [0, 0, 1, 1], [], []>} : vector<64x128xbf16>, vector<128x128xbf16>, vector<64x128xf32> -> vector<64x128xf32>
    %c0_10 = arith.constant 0 : index
    %c0_11 = arith.constant 0 : index
    %18 = vector.load %arg5[%c0_10, %c0_11] : memref<1x128xf32, #tpu.memory_space<vmem>>, vector<1x128xf32>
    %19 = vector.broadcast %18 : vector<1x128xf32> to vector<64x128xf32>
    %20 = arith.addf %17, %19 : vector<64x128xf32>
    %cst_12 = arith.constant 0.000000e+00 : f32
    %21 = vector.broadcast %cst_12 : f32 to vector<64x128xf32>
    %22 = arith.maximumf %20, %21 : vector<64x128xf32>
    %23 = arith.truncf %22 : vector<64x128xf32> to vector<64x128xbf16>
    %c0_13 = arith.constant 0 : index
    %c0_14 = arith.constant 0 : index
    %24 = vector.load %arg6[%c0_13, %c0_14] : memref<128x32xbf16, #tpu.memory_space<vmem>>, vector<128x32xbf16>
    %cst_15 = arith.constant dense<0.000000e+00> : vector<64x32xf32>
    %25 = tpu.matmul %23, %24, %cst_15 {dimension_numbers = #tpu.dot_dimension_numbers<[1], [0], [0], [1], [0, 0, 1, 1], [], []>} : vector<64x128xbf16>, vector<128x32xbf16>, vector<64x32xf32> -> vector<64x32xf32>
    %c0_16 = arith.constant 0 : index
    %c0_17 = arith.constant 0 : index
    %26 = vector.load %arg7[%c0_16, %c0_17] : memref<1x32xf32, #tpu.memory_space<vmem>>, vector<1x32xf32>
    %27 = vector.broadcast %26 : vector<1x32xf32> to vector<64x32xf32>
    %28 = arith.addf %25, %27 : vector<64x32xf32>
    %29 = vector.extract_strided_slice %11 {offsets = [0, 0], sizes = [64, 32], strides = [1, 1]} : vector<64x128xf32> to vector<64x32xf32>
    %30 = arith.mulf %28, %29 : vector<64x32xf32>
    %c0_18 = arith.constant 0 : index
    %c0_19 = arith.constant 0 : index
    %31 = vector.load %arg13[%c0_18, %c0_19] : memref<64x32xf32, #tpu.memory_space<vmem>>, vector<64x32xf32>
    tpu.vector_store %arg13[%c0_18, %c0_19], %30 {strides = array<i32>} : memref<64x32xf32, #tpu.memory_space<vmem>>, vector<64x32xf32>,
    %c0_20 = arith.constant 0 : index
    %c0_21 = arith.constant 0 : index
    %32 = tpu.strided_load %arg13[%c0_20, %c0_21] {strides = array<i32: 8, 1>} : memref<64x32xf32, #tpu.memory_space<vmem>>, vector<8x32xf32>
    %c0_22 = arith.constant 0 : index
    %c0_23 = arith.constant 0 : index
    %33 = vector.load %arg10[%c0_22, %c0_23] : memref<8x32xf32, #tpu.memory_space<vmem>>, vector<8x32xf32>
    %c1_i32 = arith.constant 1 : i32
    %34 = tpu.dynamic_rotate %33 by %c1_i32 dim 1 : vector<8x32xf32>, i32 -> vector<8x32xf32>
    %35 = arith.addf %32, %34 : vector<8x32xf32>
    %cst_24 = arith.constant 0.000000e+00 : f32
    %36 = vector.broadcast %cst_24 : f32 to vector<8x32xf32>
    %37 = arith.maximumf %35, %36 : vector<8x32xf32>
    %c0_25 = arith.constant 0 : index
    %c0_26 = arith.constant 0 : index
    %38 = tpu.strided_load %arg14[%c0_25, %c0_26] {strides = array<i32: 8, 1>} : memref<64x32xf32, #tpu.memory_space<vmem>>, vector<8x32xf32>
    tpu.strided_store %arg14[%c0_25, %c0_26], %37 {strides = array<i32: 8, 1>} : memref<64x32xf32, #tpu.memory_space<vmem>>, vector<8x32xf32>
    %c1 = arith.constant 1 : index
    %c0_27 = arith.constant 0 : index
    %39 = tpu.strided_load %arg13[%c1, %c0_27] {strides = array<i32: 8, 1>} : memref<64x32xf32, #tpu.memory_space<vmem>>, vector<8x32xf32>
    %c1_i32_28 = arith.constant 1 : i32
    %40 = tpu.dynamic_rotate %37 by %c1_i32_28 dim 1 : vector<8x32xf32>, i32 -> vector<8x32xf32>
    %41 = arith.addf %39, %40 : vector<8x32xf32>
    %cst_29 = arith.constant 0.000000e+00 : f32
    %42 = vector.broadcast %cst_29 : f32 to vector<8x32xf32>
    %43 = arith.maximumf %41, %42 : vector<8x32xf32>
    %c1_30 = arith.constant 1 : index
    %c0_31 = arith.constant 0 : index
    %44 = tpu.strided_load %arg14[%c1_30, %c0_31] {strides = array<i32: 8, 1>} : memref<64x32xf32, #tpu.memory_space<vmem>>, vector<8x32xf32>
    tpu.strided_store %arg14[%c1_30, %c0_31], %43 {strides = array<i32: 8, 1>} : memref<64x32xf32, #tpu.memory_space<vmem>>, vector<8x32xf32>
    %c2 = arith.constant 2 : index
    %c0_32 = arith.constant 0 : index
    %45 = tpu.strided_load %arg13[%c2, %c0_32] {strides = array<i32: 8, 1>} : memref<64x32xf32, #tpu.memory_space<vmem>>, vector<8x32xf32>
    %c1_i32_33 = arith.constant 1 : i32
    %46 = tpu.dynamic_rotate %43 by %c1_i32_33 dim 1 : vector<8x32xf32>, i32 -> vector<8x32xf32>
    %47 = arith.addf %45, %46 : vector<8x32xf32>
    %cst_34 = arith.constant 0.000000e+00 : f32
    %48 = vector.broadcast %cst_34 : f32 to vector<8x32xf32>
    %49 = arith.maximumf %47, %48 : vector<8x32xf32>
    %c2_35 = arith.constant 2 : index
    %c0_36 = arith.constant 0 : index
    %50 = tpu.strided_load %arg14[%c2_35, %c0_36] {strides = array<i32: 8, 1>} : memref<64x32xf32, #tpu.memory_space<vmem>>, vector<8x32xf32>
    tpu.strided_store %arg14[%c2_35, %c0_36], %49 {strides = array<i32: 8, 1>} : memref<64x32xf32, #tpu.memory_space<vmem>>, vector<8x32xf32>
    %c3 = arith.constant 3 : index
    %c0_37 = arith.constant 0 : index
    %51 = tpu.strided_load %arg13[%c3, %c0_37] {strides = array<i32: 8, 1>} : memref<64x32xf32, #tpu.memory_space<vmem>>, vector<8x32xf32>
    %c1_i32_38 = arith.constant 1 : i32
    %52 = tpu.dynamic_rotate %49 by %c1_i32_38 dim 1 : vector<8x32xf32>, i32 -> vector<8x32xf32>
    %53 = arith.addf %51, %52 : vector<8x32xf32>
    %cst_39 = arith.constant 0.000000e+00 : f32
    %54 = vector.broadcast %cst_39 : f32 to vector<8x32xf32>
    %55 = arith.maximumf %53, %54 : vector<8x32xf32>
    %c3_40 = arith.constant 3 : index
    %c0_41 = arith.constant 0 : index
    %56 = tpu.strided_load %arg14[%c3_40, %c0_41] {strides = array<i32: 8, 1>} : memref<64x32xf32, #tpu.memory_space<vmem>>, vector<8x32xf32>
    tpu.strided_store %arg14[%c3_40, %c0_41], %55 {strides = array<i32: 8, 1>} : memref<64x32xf32, #tpu.memory_space<vmem>>, vector<8x32xf32>
    %c4 = arith.constant 4 : index
    %c0_42 = arith.constant 0 : index
    %57 = tpu.strided_load %arg13[%c4, %c0_42] {strides = array<i32: 8, 1>} : memref<64x32xf32, #tpu.memory_space<vmem>>, vector<8x32xf32>
    %c1_i32_43 = arith.constant 1 : i32
    %58 = tpu.dynamic_rotate %55 by %c1_i32_43 dim 1 : vector<8x32xf32>, i32 -> vector<8x32xf32>
    %59 = arith.addf %57, %58 : vector<8x32xf32>
    %cst_44 = arith.constant 0.000000e+00 : f32
    %60 = vector.broadcast %cst_44 : f32 to vector<8x32xf32>
    %61 = arith.maximumf %59, %60 : vector<8x32xf32>
    %c4_45 = arith.constant 4 : index
    %c0_46 = arith.constant 0 : index
    %62 = tpu.strided_load %arg14[%c4_45, %c0_46] {strides = array<i32: 8, 1>} : memref<64x32xf32, #tpu.memory_space<vmem>>, vector<8x32xf32>
    tpu.strided_store %arg14[%c4_45, %c0_46], %61 {strides = array<i32: 8, 1>} : memref<64x32xf32, #tpu.memory_space<vmem>>, vector<8x32xf32>
    %c5 = arith.constant 5 : index
    %c0_47 = arith.constant 0 : index
    %63 = tpu.strided_load %arg13[%c5, %c0_47] {strides = array<i32: 8, 1>} : memref<64x32xf32, #tpu.memory_space<vmem>>, vector<8x32xf32>
    %c1_i32_48 = arith.constant 1 : i32
    %64 = tpu.dynamic_rotate %61 by %c1_i32_48 dim 1 : vector<8x32xf32>, i32 -> vector<8x32xf32>
    %65 = arith.addf %63, %64 : vector<8x32xf32>
    %cst_49 = arith.constant 0.000000e+00 : f32
    %66 = vector.broadcast %cst_49 : f32 to vector<8x32xf32>
    %67 = arith.maximumf %65, %66 : vector<8x32xf32>
    %c5_50 = arith.constant 5 : index
    %c0_51 = arith.constant 0 : index
    %68 = tpu.strided_load %arg14[%c5_50, %c0_51] {strides = array<i32: 8, 1>} : memref<64x32xf32, #tpu.memory_space<vmem>>, vector<8x32xf32>
    tpu.strided_store %arg14[%c5_50, %c0_51], %67 {strides = array<i32: 8, 1>} : memref<64x32xf32, #tpu.memory_space<vmem>>, vector<8x32xf32>
    %c6 = arith.constant 6 : index
    %c0_52 = arith.constant 0 : index
    %69 = tpu.strided_load %arg13[%c6, %c0_52] {strides = array<i32: 8, 1>} : memref<64x32xf32, #tpu.memory_space<vmem>>, vector<8x32xf32>
    %c1_i32_53 = arith.constant 1 : i32
    %70 = tpu.dynamic_rotate %67 by %c1_i32_53 dim 1 : vector<8x32xf32>, i32 -> vector<8x32xf32>
    %71 = arith.addf %69, %70 : vector<8x32xf32>
    %cst_54 = arith.constant 0.000000e+00 : f32
    %72 = vector.broadcast %cst_54 : f32 to vector<8x32xf32>
    %73 = arith.maximumf %71, %72 : vector<8x32xf32>
    %c6_55 = arith.constant 6 : index
    %c0_56 = arith.constant 0 : index
    %74 = tpu.strided_load %arg14[%c6_55, %c0_56] {strides = array<i32: 8, 1>} : memref<64x32xf32, #tpu.memory_space<vmem>>, vector<8x32xf32>
    tpu.strided_store %arg14[%c6_55, %c0_56], %73 {strides = array<i32: 8, 1>} : memref<64x32xf32, #tpu.memory_space<vmem>>, vector<8x32xf32>
    %c7 = arith.constant 7 : index
    %c0_57 = arith.constant 0 : index
    %75 = tpu.strided_load %arg13[%c7, %c0_57] {strides = array<i32: 8, 1>} : memref<64x32xf32, #tpu.memory_space<vmem>>, vector<8x32xf32>
    %c1_i32_58 = arith.constant 1 : i32
    %76 = tpu.dynamic_rotate %73 by %c1_i32_58 dim 1 : vector<8x32xf32>, i32 -> vector<8x32xf32>
    %77 = arith.addf %75, %76 : vector<8x32xf32>
    %cst_59 = arith.constant 0.000000e+00 : f32
    %78 = vector.broadcast %cst_59 : f32 to vector<8x32xf32>
    %79 = arith.maximumf %77, %78 : vector<8x32xf32>
    %c7_60 = arith.constant 7 : index
    %c0_61 = arith.constant 0 : index
    %80 = tpu.strided_load %arg14[%c7_60, %c0_61] {strides = array<i32: 8, 1>} : memref<64x32xf32, #tpu.memory_space<vmem>>, vector<8x32xf32>
    tpu.strided_store %arg14[%c7_60, %c0_61], %79 {strides = array<i32: 8, 1>} : memref<64x32xf32, #tpu.memory_space<vmem>>, vector<8x32xf32>
    %c0_62 = arith.constant 0 : index
    %c0_63 = arith.constant 0 : index
    %81 = vector.load %arg12[%c0_62, %c0_63] : memref<8x32xf32, #tpu.memory_space<vmem>>, vector<8x32xf32>
    tpu.vector_store %arg12[%c0_62, %c0_63], %79 {strides = array<i32>} : memref<8x32xf32, #tpu.memory_space<vmem>>, vector<8x32xf32>,
    %c0_64 = arith.constant 0 : index
    %c0_65 = arith.constant 0 : index
    %82 = vector.load %arg14[%c0_64, %c0_65] : memref<64x32xf32, #tpu.memory_space<vmem>>, vector<64x32xf32>
    %83 = arith.truncf %82 : vector<64x32xf32> to vector<64x32xbf16>
    %c0_66 = arith.constant 0 : index
    %c0_67 = arith.constant 0 : index
    %84 = vector.load %arg8[%c0_66, %c0_67] : memref<32x128xbf16, #tpu.memory_space<vmem>>, vector<32x128xbf16>
    %cst_68 = arith.constant dense<0.000000e+00> : vector<64x128xf32>
    %85 = tpu.matmul %83, %84, %cst_68 {dimension_numbers = #tpu.dot_dimension_numbers<[1], [0], [0], [1], [0, 0, 1, 1], [], []>} : vector<64x32xbf16>, vector<32x128xbf16>, vector<64x128xf32> -> vector<64x128xf32>
    %c0_69 = arith.constant 0 : index
    %c0_70 = arith.constant 0 : index
    %86 = vector.load %arg9[%c0_69, %c0_70] : memref<1x128xf32, #tpu.memory_space<vmem>>, vector<1x128xf32>
    %87 = vector.broadcast %86 : vector<1x128xf32> to vector<64x128xf32>
    %88 = arith.addf %85, %87 : vector<64x128xf32>
    %c0_71 = arith.constant 0 : index
    %c0_72 = arith.constant 0 : index
    %89 = vector.load %arg11[%c0_71, %c0_72] : memref<64x128xf32, #tpu.memory_space<vmem>>, vector<64x128xf32>
    tpu.vector_store %arg11[%c0_71, %c0_72], %88 {strides = array<i32>} : memref<64x128xf32, #tpu.memory_space<vmem>>, vector<64x128xf32>,
    return
  }
  func.func @transform_0(%arg0: i32) -> (i32, i32) {
    %c0_i32 = arith.constant 0 : i32
    %c0_i32_0 = arith.constant 0 : i32
    return %arg0, %c0_i32 : i32, i32
  }
  func.func @transform_1(%arg0: i32) -> (i32, i32) {
    %c0_i32 = arith.constant 0 : i32
    %c0_i32_0 = arith.constant 0 : i32
    %c0_i32_1 = arith.constant 0 : i32
    return %c0_i32, %c0_i32_0 : i32, i32
  }
  func.func @transform_2(%arg0: i32) -> (i32, i32) {
    %c0_i32 = arith.constant 0 : i32
    %c0_i32_0 = arith.constant 0 : i32
    %c0_i32_1 = arith.constant 0 : i32
    return %c0_i32, %c0_i32_0 : i32, i32
  }
  func.func @transform_3(%arg0: i32) -> (i32, i32) {
    %c0_i32 = arith.constant 0 : i32
    %c0_i32_0 = arith.constant 0 : i32
    %c0_i32_1 = arith.constant 0 : i32
    return %c0_i32, %c0_i32_0 : i32, i32
  }
  func.func @transform_4(%arg0: i32) -> (i32, i32) {
    %c0_i32 = arith.constant 0 : i32
    %c0_i32_0 = arith.constant 0 : i32
    %c0_i32_1 = arith.constant 0 : i32
    return %c0_i32, %c0_i32_0 : i32, i32
  }
  func.func @transform_5(%arg0: i32) -> (i32, i32) {
    %c0_i32 = arith.constant 0 : i32
    %c0_i32_0 = arith.constant 0 : i32
    %c0_i32_1 = arith.constant 0 : i32
    return %c0_i32, %c0_i32_0 : i32, i32
  }
  func.func @transform_6(%arg0: i32) -> (i32, i32) {
    %c0_i32 = arith.constant 0 : i32
    %c0_i32_0 = arith.constant 0 : i32
    %c0_i32_1 = arith.constant 0 : i32
    return %c0_i32, %c0_i32_0 : i32, i32
  }
  func.func @transform_7(%arg0: i32) -> (i32, i32) {
    %c0_i32 = arith.constant 0 : i32
    %c0_i32_0 = arith.constant 0 : i32
    %c0_i32_1 = arith.constant 0 : i32
    return %c0_i32, %c0_i32_0 : i32, i32
  }
  func.func @transform_8(%arg0: i32) -> (i32, i32) {
    %c0_i32 = arith.constant 0 : i32
    %c0_i32_0 = arith.constant 0 : i32
    %c0_i32_1 = arith.constant 0 : i32
    return %c0_i32, %c0_i32_0 : i32, i32
  }
  func.func @transform_9(%arg0: i32) -> (i32, i32) {
    %c0_i32 = arith.constant 0 : i32
    %c0_i32_0 = arith.constant 0 : i32
    return %arg0, %c0_i32 : i32, i32
  }
  func.func @transform_10(%arg0: i32) -> (i32, i32) {
    %c0_i32 = arith.constant 0 : i32
    %c0_i32_0 = arith.constant 0 : i32
    return %arg0, %c0_i32 : i32, i32
  }
  func.func @transform_11(%arg0: i32) -> (i32, i32) {
    %c0_i32 = arith.constant 0 : i32
    %c0_i32_0 = arith.constant 0 : i32
    return %arg0, %c0_i32 : i32, i32
  }
}

</mosaic_0001>

<bundles_post_ra>
// kernel: tpu_custom_call.1
= control target key start
LH: loop header
LB: loop body
LE: loop exit
PB: predicated region body
PF: predicated region fallthrough
CT: control target
= control target key end

     0   :  { %17 = vsyncpa [#allocation5], 0  ;;  %v1091_v2 = vmov 0   ;;  %vm92_vm0 = vcmask 130048   ;;  %s1363_s0 = inlined_call_operand.vmem [shape: bf16[64,16], index: 0, kind: input, shape index: {}]   ;;  %s1364_s1 = inlined_call_operand.vmem [shape: bf16[16,256], index: 1, kind: input, shape index: {}]   ;;  %s1365_s2 = inlined_call_operand.vmem [shape: f32[1,256], index: 2, kind: input, shape index: {}]   ;;  %s1366_s3 = inlined_call_operand.vmem [shape: bf16[128,128], index: 3, kind: input, shape index: {}]   ;;  %s1367_s4 = inlined_call_operand.vmem [shape: f32[1,128], index: 4, kind: input, shape index: {}]   ;;  %s1368_s5 = inlined_call_operand.vmem [shape: bf16[128,32], index: 5, kind: input, shape index: {}]   ;;  %s1369_s6 = inlined_call_operand.vmem [shape: f32[1,32], index: 6, kind: input, shape index: {}]   ;;  %s1370_s7 = inlined_call_operand.vmem [shape: bf16[32,128], index: 7, kind: input, shape index: {}]   ;;  %s1371_s8 = inlined_call_operand.vmem [shape: f32[1,128], index: 8, kind: input, shape index: {}]   ;;  %s1372_s9 = inlined_call_operand.vmem [shape: f32[8,32], index: 9, kind: input, shape index: {}]   ;;  %s1373_s10 = inlined_call_operand.hbm [shape: f32[64,128], index: 10, kind: output, shape index: {0}]   ;;  %s1374_s11 = inlined_call_operand.hbm [shape: f32[8,32], index: 11, kind: output, shape index: {1}]  }
   0x1   :  { %v986_v0 = vld [vmem:[%s1364_s1 + $0x4] ss:$8 sps:$4 sm:$0xff]   ;;  %v988_v1 = vld [vmem:[%s1364_s1] ss:$8 sps:$4 sm:$0xff]   ;;  %137 = vmatprep.mubr.bf16.mxu0 %v1091_v2  ;;  %v995_v7 = vld [vmem:[%s1366_s3 + $0x10] sm:$0xff]  }
   0x2   :  { %105 = vmatprep.subr.bf16.mxu0 %v986_v0  ;;  %v989_v3 = vld [vmem:[%s1363_s0] sm:$0xff]   ;;  %v994_v5 = vld [vmem:[%s1366_s3 + $0x8] sm:$0xff]   ;;  %v996_v8 = vld [vmem:[%s1366_s3 + $0x18] sm:$0xff]  }
   0x3   :  { %106 = vmatpush1.bf16.msra.mxu0 %v988_v1  ;;  %v993_v4 = vld [vmem:[%s1366_s3] sm:$0xff]   ;;  %v990_v6 = vld [vmem:[%s1363_s0 + $0x8] sm:$0xff]   ;;  %v991_v9 = vld [vmem:[%s1363_s0 + $0x10] sm:$0xff]  }
   0x4   :  { %915 = vmatprep.subr.bf16.mxu1 %v993_v4 }
   0x5   :  { %916 = vmatpush3.bf16.msra.mxu1 %v993_v4 }
   0x6   :  { %848 = vmatmul.mubr.msk.bf16.vlgmr.msra.gmra.mrb[0].mxu0 %vm92_vm0, %v989_v3  ;;  %917 = vmatprep.subr.bf16.mxu1 %v994_v5 }
   0x7   :  { %147 = vmatprep.mubr.bf16.mxu0 %v1091_v2 }
   0x9   :  { %918 = vmatpush3.bf16.msra.mxu1 %v994_v5 }
   0xa   :  { %919 = vmatprep.subr.bf16.mxu1 %v995_v7 }
   0xd   :  { %920 = vmatpush3.bf16.msra.mxu1 %v995_v7 }
   0xe   :  { %849 = vmatmul.mubr.msk.bf16.gmra.mrb[4].mxu0 %vm92_vm0, %v990_v6  ;;  %921 = vmatprep.subr.bf16.mxu1 %v996_v8 }
   0xf   :  { %157 = vmatprep.mubr.bf16.mxu0 %v1091_v2 }
  0x10   :  { %18 = vsyncpa [#allocation7], 0  ;;  %v992_v10 = vld [vmem:[%s1363_s0 + $0x18] sm:$0xff]   ;;  %v997_v11 = vld [vmem:[%s1366_s3 + $0x20] sm:$0xff]   ;;  %s1092_s29 = smov 32   ;;  %v52_v22 = vlaneseq  ;;  %vm543_vm1 = vcmask 1047808  }
  0x11   :  { %922 = vmatpush3.bf16.msra.mxu1 %v996_v8  ;;  %v998_v12 = vld [vmem:[%s1366_s3 + $0x28] sm:$0xff]   ;;  %v999_v13 = vld [vmem:[%s1366_s3 + $0x30] sm:$0xff]   ;;  %v1000_v14 = vld [vmem:[%s1366_s3 + $0x38] sm:$0xff]   ;;  %vm530_vm2 = vcmask 261120  }
  0x12   :  { %923 = vmatprep.subr.bf16.mxu1 %v997_v11  ;;  %v1207_v15 = vld [vmem:[%s1372_s9] sm:$0xff]  ;;  %v1002_v17 = vld [vmem:[%s1368_s5 + $0x8] sm:$0xff]   ;;  %v1003_v18 = vld [vmem:[%s1368_s5 + $0x10] sm:$0xff]   ;;  %v1229_v23 = vshrl.u32 %v52_v22, 7 }
  0x13   :  { %v1001_v16 = vld [vmem:[%s1368_s5] sm:$0xff]   ;;  %544 = vrot.lane.b32.xlu0 %v1207_v15, %s1092_s29  ;;  %v1004_v19 = vld [vmem:[%s1368_s5 + $0x18] sm:$0xff]   ;;  %v1006_v21 = vld [vmem:[%s1368_s5 + $0x28] sm:$0xff]  }
  0x14   :  { %939 = vmatprep.subr.bf16.mxu0 %v1001_v16  ;;  %v1005_v20 = vld [vmem:[%s1368_s5 + $0x20] sm:$0xff]   ;;  %v54_v24 = vsub.s32 0, %v1229_v23  ;;  %v1007_v63 = vld [vmem:[%s1368_s5 + $0x30] sm:$0xff]   ;;  %v1008_v0 = vld [vmem:[%s1368_s5 + $0x38] sm:$0xff]  }
  0x15   :  { %924 = vmatpush3.bf16.msra.mxu1 %v997_v11  ;;  %940 = vmatpush3.bf16.msra.mxu0 %v1001_v16  ;;  %v1235_v25 = vld [vmem:[%s1365_s2] sm:$0x3] }
  0x16   :  { %850 = vmatmul.mubr.msk.bf16.gmra.mrb[8].mxu0 %vm92_vm0, %v991_v9  ;;  %925 = vmatprep.subr.bf16.mxu1 %v998_v12  ;;  %v55_v26 = vrot.slane %v1235_v25, %v54_v24  ;;  %v860_v3 = vld [vmem:[%s1367_s4] ss:$0 sm:$0xff]  ;;  %s1093_s4 = smov 97  }
  0x17   :  { %167 = vmatprep.mubr.bf16.mxu0 %v1091_v2  ;;  %941 = vmatprep.subr.bf16.mxu0 %v1002_v17 }
  0x19   :  { %926 = vmatpush3.bf16.msra.mxu1 %v998_v12  ;;  %942 = vmatpush3.bf16.msra.mxu0 %v1002_v17 }
  0x1a   :  { %927 = vmatprep.subr.bf16.mxu1 %v999_v13  ;;  %943 = vmatprep.subr.bf16.mxu0 %v1003_v18 }
  0x1d   :  { %928 = vmatpush3.bf16.msra.mxu1 %v999_v13  ;;  %944 = vmatpush3.bf16.msra.mxu0 %v1003_v18 }
  0x1e   :  { %851 = vmatmul.mubr.msk.bf16.gmra.mrb[12].mxu0 %vm92_vm0, %v992_v10  ;;  %929 = vmatprep.subr.bf16.mxu1 %v1000_v14 }
  0x1f   :  { %945 = vmatprep.subr.bf16.mxu0 %v1004_v19 }
  0x21   :  { %930 = vmatpush3.bf16.msra.mxu1 %v1000_v14  ;;  %946 = vmatpush3.bf16.msra.mxu0 %v1004_v19 }
  0x22   :  { %947 = vmatprep.subr.bf16.mxu0 %v1005_v20 }
  0x25   :  { %948 = vmatpush3.bf16.msra.mxu0 %v1005_v20 }
  0x26   :  { %949 = vmatprep.subr.bf16.mxu0 %v1006_v21 }
  0x29   :  { %950 = vmatpush3.bf16.msra.mxu0 %v1006_v21 }
  0x2a   :  { %951 = vmatprep.subr.bf16.mxu0 %v1007_v63 }
  0x2d   :  { %952 = vmatpush3.bf16.msra.mxu0 %v1007_v63 }
  0x2e   :  { %953 = vmatprep.subr.bf16.mxu0 %v1008_v0 }
  0x31   :  { %954 = vmatpush3.bf16.msra.mxu0 %v1008_v0 }
  0x85   :  { %v545_v1 = vpop.permute.xlu0 %544 }
  0x86   :  { %v546_v2 = vsel %vm543_vm1, %v545_v1, %v1207_v15 }
  0x87   :  { %547 = vrot.lane.b32.xlu0 %v546_v2, %s1092_s29 }
  0xd9   :  { %v139_v27 = vpop.f32.mrb[0].mxu0 }
  0xda   :  { %v140_v28 = vadd.f32 %v139_v27, %v55_v26  ;;  %v1238_v29 = vpop.f32.mrb[1].mxu0 }
  0xdb   :  { %v143_v30 = vpop.f32.mrb[2].mxu0 }
  0xdc   :  { %v144_v31 = vadd.f32 %v143_v30, %v55_v26  ;;  %v1240_v32 = vpop.f32.mrb[3].mxu0  ;;  %v226_v33 = vmax.f32 %v140_v28, 0.0 }
  0xde   :  { %v227_v34 = vmax.f32 %v144_v31, 0.0 }
  0xe0   :  { %v234_v35 = vpack.c.bf16 %v227_v34, %v226_v33 }
  0xe1   :  { %v149_v36 = vpop.f32.mrb[4].mxu0 }
  0xe2   :  { %v150_v37 = vadd.f32 %v149_v36, %v55_v26  ;;  %v1242_v38 = vpop.f32.mrb[5].mxu0  ;;  %931 = vmatprep.mubr.bf16.mxu1 %v234_v35 }
  0xe3   :  { %v153_v39 = vpop.f32.mrb[6].mxu0 }
  0xe4   :  { %v154_v40 = vadd.f32 %v153_v39, %v55_v26  ;;  %v1244_v41 = vpop.f32.mrb[7].mxu0  ;;  %v228_v42 = vmax.f32 %v150_v37, 0.0 }
  0xe6   :  { %v229_v43 = vmax.f32 %v154_v40, 0.0 }
  0xe8   :  { %v235_v44 = vpack.c.bf16 %v229_v43, %v228_v42 }
  0xe9   :  { %v159_v45 = vpop.f32.mrb[8].mxu0 }
  0xea   :  { %v160_v46 = vadd.f32 %v159_v45, %v55_v26  ;;  %v1246_v47 = vpop.f32.mrb[9].mxu0  ;;  %932 = vmatmul.mubr.bf16.vlgmr.msra.gmra.mrb[0].mxu1 %v235_v44 }
  0xeb   :  { %v163_v48 = vpop.f32.mrb[10].mxu0 }
  0xec   :  { %v164_v49 = vadd.f32 %v163_v48, %v55_v26  ;;  %v1248_v50 = vpop.f32.mrb[11].mxu0  ;;  %v230_v51 = vmax.f32 %v160_v46, 0.0 }
  0xee   :  { %v231_v52 = vmax.f32 %v164_v49, 0.0 }
  0xf0   :  { %v236_v53 = vpack.c.bf16 %v231_v52, %v230_v51 }
  0xf1   :  { %v169_v54 = vpop.f32.mrb[12].mxu0 }
  0xf2   :  { %v170_v55 = vadd.f32 %v169_v54, %v55_v26  ;;  %v1250_v56 = vpop.f32.mrb[13].mxu0  ;;  %935 = vmatprep.mubr.bf16.mxu1 %v236_v53 }
  0xf3   :  { %v173_v57 = vpop.f32.mrb[14].mxu0 }
  0xf4   :  { %v174_v58 = vadd.f32 %v173_v57, %v55_v26  ;;  %v1252_v59 = vpop.f32.mrb[15].mxu0  ;;  %v232_v60 = vmax.f32 %v170_v55, 0.0 }
  0xf6   :  { %v233_v61 = vmax.f32 %v174_v58, 0.0 }
  0xf8   :  { %v237_v62 = vpack.c.bf16 %v233_v61, %v232_v60 }
  0xf9   :  { %v548_v19 = vpop.permute.xlu0 %547 }
  0xfa   :  { %936 = vmatmul.mubr.bf16.gmra.mrb[4].mxu1 %v237_v62  ;;  %v549_v20 = vsel %vm543_vm1, %v548_v19, %v1207_v15  ;;  %v58_v15 = vsub.s32 1, %v1229_v23 }
  0xfb   :  { %551 = vrot.lane.b32.xlu1 %v549_v20, %s1093_s4 }
  0xfc   :  { %v59_v40 = vrot.slane %v1235_v25, %v58_v15 }
  0xfe   :  { %v142_v42 = vadd.f32 %v1238_v29, %v59_v40  ;;  %v152_v44 = vadd.f32 %v1242_v38, %v59_v40  ;;  %v156_v45 = vadd.f32 %v1244_v41, %v59_v40  ;;  %v146_v46 = vadd.f32 %v1240_v32, %v59_v40 }
  0xff   :  { %v162_v23 = vadd.f32 %v1246_v47, %v59_v40  ;;  %v166_v25 = vadd.f32 %v1248_v50, %v59_v40  ;;  %v172_v29 = vadd.f32 %v1250_v56, %v59_v40  ;;  %v176_v41 = vadd.f32 %v1252_v59, %v59_v40  ;;  %v869_v56 = vld [vmem:[%s1369_s6] ss:$0 sm:$0xff] }
 0x100   :  { %v852_v43 = vmul.f32 -1.442695, %v142_v42  ;;  %v854_v48 = vmul.f32 -1.442695, %v152_v44  ;;  %v855_v49 = vmul.f32 -1.442695, %v156_v45 }
 0x101   :  { %v853_v51 = vmul.f32 -1.442695, %v146_v46  ;;  %v856_v54 = vmul.f32 -1.442695, %v162_v23  ;;  %v857_v32 = vmul.f32 -1.442695, %v166_v25 }
 0x102   :  { %1011 = vpow2.f32 %v852_v43  ;;  %v858_v57 = vmul.f32 -1.442695, %v172_v29  ;;  %v859_v61 = vmul.f32 -1.442695, %v176_v41 }
 0x103   :  { %1013 = vpow2.f32 %v854_v48 }
 0x104   :  { %1015 = vpow2.f32 %v855_v49 }
 0x105   :  { %1017 = vpow2.f32 %v853_v51 }
 0x10c   :  { %v1012_v52 = vpop.eup %1011 }
 0x10d   :  { %v202_v53 = vadd.f32 1.0, %v1012_v52  ;;  %v1014_v38 = vpop.eup %1013 }
 0x10e   :  { %v1016_v55 = vpop.eup %1015  ;;  %v204_v60 = vadd.f32 1.0, %v1014_v38 }
 0x10f   :  { %v1018_v58 = vpop.eup %1017  ;;  %1019 = vrcp.f32 %v202_v53  ;;  %v205_v62 = vadd.f32 1.0, %v1016_v55 }
 0x110   :  { %1021 = vpow2.f32 %v856_v54  ;;  %v203_v47 = vadd.f32 1.0, %v1018_v58 }
 0x111   :  { %1023 = vpow2.f32 %v857_v32 }
 0x112   :  { %1025 = vpow2.f32 %v858_v57 }
 0x113   :  { %1027 = vrcp.f32 %v204_v60 }
 0x114   :  { %1029 = vpow2.f32 %v859_v61 }
 0x115   :  { %1031 = vrcp.f32 %v205_v62 }
 0x116   :  { %1033 = vrcp.f32 %v203_v47 }
 0x119   :  { %v1020_v50 = vpop.eup %1019 }
 0x11a   :  { %v1022_v59 = vpop.eup %1021 }
 0x11b   :  { %v1024_v63 = vpop.eup %1023 }
 0x11c   :  { %v1026_v1 = vpop.eup %1025 }
 0x16d   :  { %v552_v43 = vpop.permute.xlu1 %551 }
 0x1bd   :  { %v933_v4 = vpop.f32.mrb[0].mxu1 }
 0x1be   :  { %v352_v5 = vadd.f32 %v933_v4, %v860_v3  ;;  %v343_v6 = vpop.f32.mrb[1].mxu1  ;;  %v1028_v4 = vpop.eup %1027 }
 0x1bf   :  { %v344_v7 = vadd.f32 %v860_v3, %v343_v6  ;;  %v934_v8 = vpop.f32.mrb[2].mxu1 }
 0x1c0   :  { %v355_v9 = vadd.f32 %v934_v8, %v860_v3  ;;  %v346_v10 = vpop.f32.mrb[3].mxu1  ;;  %v376_v12 = vmax.f32 %v352_v5, 0.0 }
 0x1c1   :  { %v347_v11 = vadd.f32 %v860_v3, %v346_v10  ;;  %v374_v14 = vmax.f32 %v344_v7, 0.0  ;;  %v1030_v7 = vpop.eup %1029 }
 0x1c2   :  { %v377_v13 = vmax.f32 %v355_v9, 0.0  ;;  %v209_v19 = vadd.f32 1.0, %v1030_v7 }
 0x1c3   :  { %v375_v16 = vmax.f32 %v347_v11, 0.0  ;;  %v1032_v11 = vpop.eup %1031 }
 0x1c4   :  { %v383_v17 = vpack.c.bf16 %v377_v13, %v376_v12  ;;  %v208_v12 = vadd.f32 1.0, %v1026_v1 }
 0x1c5   :  { %v382_v18 = vpack.c.bf16 %v375_v16, %v374_v14  ;;  %v1034_v16 = vpop.eup %1033 }
 0x1c6   :  { %1035 = vrcp.f32 %v208_v12 }
 0x1c7   :  { %955 = vmatprep.mubr.bf16.mxu0 %v382_v18 }
 0x1c8   :  { %956 = vmatmul.mubr.bf16.vlgmr.msra.gmra.mrb[16].mxu0 %v383_v17  ;;  %v206_v17 = vadd.f32 1.0, %v1022_v59 }
 0x1ca   :  { %1037 = vrcp.f32 %v206_v17 }
 0x1cb   :  { %1039 = vrcp.f32 %v209_v19 }
 0x1cd   :  { %v937_v21 = vpop.f32.mrb[4].mxu1 }
 0x1ce   :  { %v368_v22 = vadd.f32 %v937_v21, %v860_v3  ;;  %v359_v24 = vpop.f32.mrb[5].mxu1  ;;  %v207_v21 = vadd.f32 1.0, %v1024_v63 }
 0x1cf   :  { %v360_v26 = vadd.f32 %v860_v3, %v359_v24  ;;  %v938_v27 = vpop.f32.mrb[6].mxu1 }
 0x1d0   :  { %v371_v28 = vadd.f32 %v938_v27, %v860_v3  ;;  %v362_v30 = vpop.f32.mrb[7].mxu1  ;;  %v380_v33 = vmax.f32 %v368_v22, 0.0  ;;  %1041 = vrcp.f32 %v207_v21  ;;  %v1036_v27 = vpop.eup %1035 }
 0x1d1   :  { %v363_v31 = vadd.f32 %v860_v3, %v362_v30  ;;  %v378_v35 = vmax.f32 %v360_v26, 0.0 }
 0x1d2   :  { %v381_v34 = vmax.f32 %v371_v28, 0.0 }
 0x1d3   :  { %v379_v36 = vmax.f32 %v363_v31, 0.0 }
 0x1d4   :  { %v385_v37 = vpack.c.bf16 %v381_v34, %v380_v33  ;;  %v1038_v31 = vpop.eup %1037 }
 0x1d5   :  { %v384_v39 = vpack.c.bf16 %v379_v36, %v378_v35  ;;  %v1040_v36 = vpop.eup %1039 }
 0x1d7   :  { %959 = vmatprep.mubr.bf16.mxu0 %v384_v39 }
 0x1d8   :  { %960 = vmatmul.mubr.bf16.gmra.mrb[20].mxu0 %v385_v37 }
 0x1da   :  { %v1042_v15 = vpop.eup %1041 }
 0x29b   :  { %v957_v0 = vpop.f32.mrb[16].mxu0 }
 0x29c   :  { %v500_v2 = vadd.f32 %v957_v0, %v869_v56  ;;  %v491_v3 = vpop.f32.mrb[17].mxu0 }
 0x29d   :  { %v492_v5 = vadd.f32 %v869_v56, %v491_v3  ;;  %v958_v6 = vpop.f32.mrb[18].mxu0 }
 0x29e   :  { %v524_v8 = vmul.f32 %v1028_v4, %v500_v2  ;;  %v503_v9 = vadd.f32 %v958_v6, %v869_v56  ;;  %v494_v10 = vpop.f32.mrb[19].mxu0 }
 0x29f   :  { %v522_v13 = vmul.f32 %v1020_v50, %v492_v5  ;;  %v495_v14 = vadd.f32 %v869_v56, %v494_v10 }
 0x2a0   :  { %533 = vst.msk [vmem:[#allocation2 + $0x10] sm:$0xff] %vm530_vm2, %v524_v8  ;;  %v525_v18 = vmul.f32 %v1032_v11, %v503_v9 }
 0x2a1   :  { %531 = vst.msk [vmem:[#allocation2] sm:$0xff] %vm530_vm2, %v522_v13  ;;  %v523_v20 = vmul.f32 %v1034_v16, %v495_v14 }
 0x2a2   :  { %534 = vst.msk [vmem:[#allocation2 + $0x18] sm:$0xff] %vm530_vm2, %v525_v18 }
 0x2a3   :  { %532 = vst.msk [vmem:[#allocation2 + $0x8] sm:$0xff] %vm530_vm2, %v523_v20 }
 0x2aa   :  { %v539_v44 = vld [vmem:[#allocation2] ss:$8 sm:$0xf]  ;;  %v559_v53 = vld [vmem:[#allocation2 + $0x1] ss:$8 sm:$0xf] }
 0x2ab   :  { %v961_v22 = vpop.f32.mrb[20].mxu0  ;;  %v578_v62 = vld [vmem:[#allocation2 + $0x2] ss:$8 sm:$0xf] }
 0x2ac   :  { %v516_v24 = vadd.f32 %v961_v22, %v869_v56  ;;  %v507_v26 = vpop.f32.mrb[21].mxu0  ;;  %v597_v4 = vld [vmem:[#allocation2 + $0x3] ss:$8 sm:$0xf] }
 0x2ad   :  { %v508_v28 = vadd.f32 %v869_v56, %v507_v26  ;;  %v962_v30 = vpop.f32.mrb[22].mxu0  ;;  %v616_v14 = vld [vmem:[#allocation2 + $0x4] ss:$8 sm:$0xf] }
 0x2ae   :  { %v528_v33 = vmul.f32 %v1036_v27, %v516_v24  ;;  %v519_v34 = vadd.f32 %v962_v30, %v869_v56  ;;  %v510_v35 = vpop.f32.mrb[23].mxu0  ;;  %v635_v27 = vld [vmem:[#allocation2 + $0x5] ss:$8 sm:$0xf] }
 0x2af   :  { %v526_v37 = vmul.f32 %v1038_v31, %v508_v28  ;;  %v511_v39 = vadd.f32 %v869_v56, %v510_v35 }
 0x2b0   :  { %537 = vst.msk [vmem:[#allocation2 + $0x30] sm:$0xff] %vm530_vm2, %v528_v33  ;;  %v529_v40 = vmul.f32 %v1040_v36, %v519_v34 }
 0x2b1   :  { %535 = vst.msk [vmem:[#allocation2 + $0x20] sm:$0xff] %vm530_vm2, %v526_v37  ;;  %v527_v42 = vmul.f32 %v1042_v15, %v511_v39  ;;  %v654_v15 = vld [vmem:[#allocation2 + $0x6] ss:$8 sm:$0xf] }
 0x2b2   :  { %538 = vst.msk [vmem:[#allocation2 + $0x38] sm:$0xff] %vm530_vm2, %v529_v40 }
 0x2b3   :  { %536 = vst.msk [vmem:[#allocation2 + $0x28] sm:$0xff] %vm530_vm2, %v527_v42 }
 0x2ba   :  { %v540_v45 = vld [vmem:[#allocation2] ss:$8 sm:$0xf0]  ;;  %v560_v29 = vld [vmem:[#allocation2 + $0x1] ss:$8 sm:$0xf0] }
 0x2bb   :  { %v541_v46 = vor.u32 %v540_v45, %v539_v44  ;;  %v561_v38 = vor.u32 %v560_v29, %v559_v53  ;;  %v579_v61 = vld [vmem:[#allocation2 + $0x2] ss:$8 sm:$0xf0]  ;;  %v598_v3 = vld [vmem:[#allocation2 + $0x3] ss:$8 sm:$0xf0] }
 0x2bc   :  { %v580_v47 = vor.u32 %v579_v61, %v578_v62  ;;  %v599_v5 = vor.u32 %v598_v3, %v597_v4  ;;  %v617_v13 = vld [vmem:[#allocation2 + $0x4] ss:$8 sm:$0xf0]  ;;  %v636_v26 = vld [vmem:[#allocation2 + $0x5] ss:$8 sm:$0xf0] }
 0x2bd   :  { %v554_v48 = vadd.f32 %v552_v43, %v541_v46  ;;  %v618_v16 = vor.u32 %v617_v13, %v616_v14  ;;  %v637_v28 = vor.u32 %v636_v26, %v635_v27  ;;  %v655_v39 = vld [vmem:[#allocation2 + $0x6] ss:$8 sm:$0xf0] }
 0x2be   :  { %v656_v40 = vor.u32 %v655_v39, %v654_v15  ;;  %v1009_v45 = vld [vmem:[%s1370_s7] sm:$0xff]  }
 0x2bf   :  { %v555_v49 = vmax.f32 %v554_v48, 0.0  ;;  %963 = vmatprep.subr.bf16.mxu0 %v1009_v45  ;;  %975 = vmatprep.subr.bf16.mxu1 %v1009_v45 }
 0x2c0   :  { %964 = vmatpush3.bf16.msra.mxu0 %v1009_v45  ;;  %977 = vmatpush3.bf16.msra.mxu1 %v1009_v45 }
 0x2c1   :  { %556 = vst [vmem:[#allocation3] ss:$8 sm:$0xf] %v555_v49  ;;  %557 = vst [vmem:[#allocation3] ss:$8 sm:$0xf0] %v555_v49  ;;  %562 = vrot.lane.b32.xlu1 %v555_v49, %s1092_s29 }
 0x333   :  { %v563_v51 = vpop.permute.xlu1 %562 }
 0x334   :  { %v564_v52 = vsel %vm543_vm1, %v563_v51, %v555_v49 }
 0x335   :  { %565 = vrot.lane.b32.xlu0 %v564_v52, %s1092_s29 }
 0x3a7   :  { %v566_v23 = vpop.permute.xlu0 %565 }
 0x3a8   :  { %v567_v25 = vsel %vm543_vm1, %v566_v23, %v555_v49  ;;  %v1010_v49 = vld [vmem:[%s1370_s7 + $0x8] sm:$0xff]   ;;  %s1094_s7 = smov [#allocation6]  }
 0x3a9   :  { %569 = vrot.lane.b32.xlu1 %v567_v25, %s1093_s4  ;;  %965 = vmatprep.subr.bf16.mxu0 %v1010_v49  ;;  %v674_v23 = vld [vmem:[#allocation2 + $0x7] ss:$8 sm:$0xf0]  ;;  %s830_s1 = sshll.u32 %s1094_s7, 4  ;;  %s831_s1 = int_to_ptr.vmem [resolvable:$true] %s830_s1 }
 0x3aa   :  { %976 = vmatprep.subr.bf16.mxu1 %v1010_v49  ;;  %966 = vmatpush3.bf16.msra.mxu0 %v1010_v49  ;;  %v673_v25 = vld [vmem:[#allocation2 + $0x7] ss:$8 sm:$0xf]  ;;  %s1043_s27 = scalar_lea.vmem %s831_s1, 128  ;;  %p1048_p1 = scmp.lt.s32.totalorder %s831_s1, %s831_s1 }
 0x3ab   :  { %978 = vmatpush3.bf16.msra.mxu1 %v1010_v49  ;;  %v675_v29 = vor.u32 %v674_v23, %v673_v25  ;;  %p1044_p0 = scmp.ne.s32.totalorder %s831_s1, %s1043_s27  ;;  %p1049_p2 = scmp.lt.s32.totalorder %s1043_s27, %s1043_s27 }
 0x3ad   :  { %p1050_p3 = por %p1049_p2, %p1048_p1 }
 0x3af   :  { %p1051_p4 = pnand %p1050_p3, %p1044_p0 }
 0x41b   :  { %v570_v54 = vpop.permute.xlu1 %569 }
 0x41c   :  { %v572_v41 = vadd.f32 %v570_v54, %v561_v38 }
 0x41e   :  { %v573_v32 = vmax.f32 %v572_v41, 0.0 }
 0x420   :  { %575 = vst [vmem:[#allocation3 + $0x1] ss:$8 sm:$0xf] %v573_v32  ;;  %576 = vst [vmem:[#allocation3 + $0x1] ss:$8 sm:$0xf0] %v573_v32  ;;  %581 = vrot.lane.b32.xlu0 %v573_v32, %s1092_s29 }
 0x492   :  { %v582_v55 = vpop.permute.xlu0 %581 }
 0x493   :  { %v583_v57 = vsel %vm543_vm1, %v582_v55, %v573_v32 }
 0x494   :  { %584 = vrot.lane.b32.xlu1 %v583_v57, %s1092_s29 }
 0x506   :  { %v585_v58 = vpop.permute.xlu1 %584 }
 0x507   :  { %v586_v60 = vsel %vm543_vm1, %v585_v58, %v573_v32 }
 0x508   :  { %588 = vrot.lane.b32.xlu0 %v586_v60, %s1093_s4 }
 0x57a   :  { %v589_v50 = vpop.permute.xlu0 %588 }
 0x57b   :  { %v591_v56 = vadd.f32 %v589_v50, %v580_v47 }
 0x57d   :  { %v592_v59 = vmax.f32 %v591_v56, 0.0 }
 0x57f   :  { %594 = vst [vmem:[#allocation3 + $0x2] ss:$8 sm:$0xf] %v592_v59  ;;  %595 = vst [vmem:[#allocation3 + $0x2] ss:$8 sm:$0xf0] %v592_v59  ;;  %600 = vrot.lane.b32.xlu1 %v592_v59, %s1092_s29 }
 0x5f1   :  { %v601_v63 = vpop.permute.xlu1 %600 }
 0x5f2   :  { %v602_v0 = vsel %vm543_vm1, %v601_v63, %v592_v59 }
 0x5f3   :  { %603 = vrot.lane.b32.xlu0 %v602_v0, %s1092_s29 }
 0x665   :  { %v604_v1 = vpop.permute.xlu0 %603 }
 0x666   :  { %v605_v2 = vsel %vm543_vm1, %v604_v1, %v592_v59 }
 0x667   :  { %607 = vrot.lane.b32.xlu1 %v605_v2, %s1093_s4 }
 0x6d9   :  { %v608_v6 = vpop.permute.xlu1 %607 }
 0x6da   :  { %v610_v7 = vadd.f32 %v608_v6, %v599_v5 }
 0x6dc   :  { %v611_v8 = vmax.f32 %v610_v7, 0.0 }
 0x6de   :  { %613 = vst [vmem:[#allocation3 + $0x3] ss:$8 sm:$0xf] %v611_v8  ;;  %614 = vst [vmem:[#allocation3 + $0x3] ss:$8 sm:$0xf0] %v611_v8  ;;  %619 = vrot.lane.b32.xlu0 %v611_v8, %s1092_s29 }
 0x750   :  { %v620_v9 = vpop.permute.xlu0 %619 }
 0x751   :  { %v621_v10 = vsel %vm543_vm1, %v620_v9, %v611_v8 }
 0x752   :  { %622 = vrot.lane.b32.xlu1 %v621_v10, %s1092_s29 }
 0x7c4   :  { %v623_v11 = vpop.permute.xlu1 %622 }
 0x7c5   :  { %v624_v12 = vsel %vm543_vm1, %v623_v11, %v611_v8 }
 0x7c6   :  { %626 = vrot.lane.b32.xlu0 %v624_v12, %s1093_s4 }
 0x838   :  { %v627_v17 = vpop.permute.xlu0 %626 }
 0x839   :  { %v629_v18 = vadd.f32 %v627_v17, %v618_v16 }
 0x83b   :  { %v630_v19 = vmax.f32 %v629_v18, 0.0 }
 0x83d   :  { %632 = vst [vmem:[#allocation3 + $0x4] ss:$8 sm:$0xf] %v630_v19  ;;  %633 = vst [vmem:[#allocation3 + $0x4] ss:$8 sm:$0xf0] %v630_v19  ;;  %638 = vrot.lane.b32.xlu1 %v630_v19, %s1092_s29 }
 0x8af   :  { %v639_v20 = vpop.permute.xlu1 %638 }
 0x8b0   :  { %v640_v21 = vsel %vm543_vm1, %v639_v20, %v630_v19 }
 0x8b1   :  { %641 = vrot.lane.b32.xlu0 %v640_v21, %s1092_s29 }
 0x923   :  { %v642_v22 = vpop.permute.xlu0 %641 }
 0x924   :  { %v643_v24 = vsel %vm543_vm1, %v642_v22, %v630_v19 }
 0x925   :  { %645 = vrot.lane.b32.xlu1 %v643_v24, %s1093_s4 }
 0x997   :  { %v646_v30 = vpop.permute.xlu1 %645 }
 0x998   :  { %v648_v31 = vadd.f32 %v646_v30, %v637_v28 }
 0x99a   :  { %v649_v33 = vmax.f32 %v648_v31, 0.0 }
 0x99c   :  { %651 = vst [vmem:[#allocation3 + $0x5] ss:$8 sm:$0xf] %v649_v33  ;;  %652 = vst [vmem:[#allocation3 + $0x5] ss:$8 sm:$0xf0] %v649_v33  ;;  %657 = vrot.lane.b32.xlu0 %v649_v33, %s1092_s29 }
 0xa0e   :  { %v658_v34 = vpop.permute.xlu0 %657 }
 0xa0f   :  { %v659_v35 = vsel %vm543_vm1, %v658_v34, %v649_v33 }
 0xa10   :  { %660 = vrot.lane.b32.xlu1 %v659_v35, %s1092_s29 }
 0xa82   :  { %v661_v36 = vpop.permute.xlu1 %660 }
 0xa83   :  { %v662_v37 = vsel %vm543_vm1, %v661_v36, %v649_v33 }
 0xa84   :  { %664 = vrot.lane.b32.xlu0 %v662_v37, %s1093_s4 }
 0xaf6   :  { %v665_v42 = vpop.permute.xlu0 %664 }
 0xaf7   :  { %v667_v43 = vadd.f32 %v665_v42, %v656_v40 }
 0xaf9   :  { %v668_v44 = vmax.f32 %v667_v43, 0.0 }
 0xafb   :  { %670 = vst [vmem:[#allocation3 + $0x6] ss:$8 sm:$0xf] %v668_v44  ;;  %671 = vst [vmem:[#allocation3 + $0x6] ss:$8 sm:$0xf0] %v668_v44  ;;  %676 = vrot.lane.b32.xlu1 %v668_v44, %s1092_s29 }
 0xb6d   :  { %v677_v46 = vpop.permute.xlu1 %676 }
 0xb6e   :  { %v678_v48 = vsel %vm543_vm1, %v677_v46, %v668_v44 }
 0xb6f   :  { %679 = vrot.lane.b32.xlu0 %v678_v48, %s1092_s29 }
 0xbe1   :  { %v680_v51 = vpop.permute.xlu0 %679 }
 0xbe2   :  { %v681_v52 = vsel %vm543_vm1, %v680_v51, %v668_v44 }
 0xbe3   :  { %683 = vrot.lane.b32.xlu1 %v681_v52, %s1093_s4 }
 0xc55   :  { %v684_v53 = vpop.permute.xlu1 %683 }
 0xc56   :  { %v686_v38 = vadd.f32 %v684_v53, %v675_v29 }
 0xc58   :  { %v687_v54 = vmax.f32 %v686_v38, 0.0 }
 0xc5a   :  { %689 = vst [vmem:[#allocation3 + $0x7] ss:$8 sm:$0xf] %v687_v54  ;;  %690 = vst [vmem:[#allocation3 + $0x7] ss:$8 sm:$0xf0] %v687_v54 }
 0xc5b   :  { %691 = vst.msk [vmem:[#allocation6] sm:$0xff] %vm530_vm2, %v687_v54 }
 0xc61   :  { %v692_v41 = vld [vmem:[#allocation3] sm:$0xff]  ;;  %v693_v32 = vld [vmem:[#allocation3 + $0x8] sm:$0xff]  ;;  %v694_v60 = vld [vmem:[#allocation3 + $0x10] sm:$0xff] }
 0xc62   :  { %v696_v55 = vld [vmem:[#allocation3 + $0x20] sm:$0xff]  ;;  %v700_v57 = vpack.c.bf16 %v693_v32, %v692_v41  ;;  %v697_v58 = vld [vmem:[#allocation3 + $0x28] sm:$0xff]  ;;  %v695_v61 = vld [vmem:[#allocation3 + $0x18] sm:$0xff] }
 0xc63   :  { %v702_v62 = vpack.c.bf16 %v697_v58, %v696_v55  ;;  %v701_v47 = vpack.c.bf16 %v695_v61, %v694_v60  ;;  %v698_v50 = vld [vmem:[#allocation3 + $0x30] sm:$0xff]  ;;  %v699_v56 = vld [vmem:[#allocation3 + $0x38] sm:$0xff] }
 0xc64   :  { %967 = vmatprep.mubr.msk.bf16.mxu0 %vm530_vm2, %v700_v57  ;;  %v703_v59 = vpack.c.bf16 %v699_v56, %v698_v50 }
 0xc65   :  { %971 = vmatprep.mubr.msk.bf16.mxu1 %vm530_vm2, %v702_v62  ;;  %968 = vmatmul.mubr.msk.bf16.vlgmr.msra.gmra.mrb[24].mxu0 %vm530_vm2, %v701_v47 }
 0xc66   :  { %972 = vmatmul.mubr.msk.bf16.vlgmr.msra.gmra.mrb[8].mxu1 %vm530_vm2, %v703_v59 }
 0xc67   :  { %1054 = shalt.err (!%p1051_p4)
}
 0xc68   :  { %s1055_s3 = scalar_lea.hbm %s1374_s11, 128 }
 0xc69   :  { %p1056_p5 = scmp.ne.s32.totalorder %s1374_s11, %s1055_s3  ;;  %p1059_p6 = scmp.lt.u32.totalorder %s1055_s3, %s1374_s11 }
 0xc6b   :  { %p1061_p7 = pnand %p1059_p6, %p1056_p5 }
 0xc6d   :  { %1064 = shalt.err (!%p1061_p7)
}
 0xc6e   :  { %833 = dma.vmem_to_hbm [thread:$0]  %s831_s1, 128, %s1374_s11, [#allocation7]   ;;  %v878_v63 = vld [vmem:[%s1371_s8] ss:$0 sm:$0xff] }
 0xc6f   :  { %s1095_s18 = smov [#allocation4]  }
 0xc70   :  { %s817_s2 = sshll.u32 %s1095_s18, 4  ;;  %s818_s2 = int_to_ptr.vmem [resolvable:$true] %s817_s2 }
 0xc71   :  { %s1065_s8 = scalar_lea.vmem %s818_s2, 1024  ;;  %p1070_p9 = scmp.lt.s32.totalorder %s818_s2, %s818_s2 }
 0xc72   :  { %p1066_p8 = scmp.ne.s32.totalorder %s818_s2, %s1065_s8  ;;  %p1071_p10 = scmp.lt.s32.totalorder %s1065_s8, %s1065_s8 }
 0xc74   :  { %p1072_p11 = por %p1071_p10, %p1070_p9 }
 0xc76   :  { %p1073_p12 = pnand %p1072_p11, %p1066_p8 }
 0xd38   :  { %v969_v0 = vpop.f32.mrb[24].mxu0 }
 0xd39   :  { %v782_v1 = vadd.f32 %v969_v0, %v878_v63  ;;  %v973_v2 = vpop.f32.mrb[8].mxu1  ;;  %v773_v3 = vpop.f32.mrb[25].mxu0 }
 0xd3a   :  { %v798_v4 = vadd.f32 %v973_v2, %v878_v63  ;;  %v774_v5 = vadd.f32 %v878_v63, %v773_v3  ;;  %v789_v6 = vpop.f32.mrb[9].mxu1  ;;  %v970_v7 = vpop.f32.mrb[26].mxu0 }
 0xd3b   :  { %806 = vst [vmem:[#allocation4 + $0x10] sm:$0xff] %v782_v1  ;;  %v790_v8 = vadd.f32 %v878_v63, %v789_v6  ;;  %v785_v9 = vadd.f32 %v970_v7, %v878_v63  ;;  %v974_v10 = vpop.f32.mrb[10].mxu1  ;;  %v776_v11 = vpop.f32.mrb[27].mxu0 }
 0xd3c   :  { %810 = vst [vmem:[#allocation4 + $0x30] sm:$0xff] %v798_v4  ;;  %804 = vst [vmem:[#allocation4] sm:$0xff] %v774_v5  ;;  %v801_v12 = vadd.f32 %v974_v10, %v878_v63  ;;  %v777_v13 = vadd.f32 %v878_v63, %v776_v11  ;;  %v792_v14 = vpop.f32.mrb[11].mxu1 }
 0xd3d   :  { %808 = vst [vmem:[#allocation4 + $0x20] sm:$0xff] %v790_v8  ;;  %807 = vst [vmem:[#allocation4 + $0x18] sm:$0xff] %v785_v9  ;;  %v793_v16 = vadd.f32 %v878_v63, %v792_v14 }
 0xd3e   :  { %811 = vst [vmem:[#allocation4 + $0x38] sm:$0xff] %v801_v12  ;;  %805 = vst [vmem:[#allocation4 + $0x8] sm:$0xff] %v777_v13 }
 0xd3f   :  { %809 = vst [vmem:[#allocation4 + $0x28] sm:$0xff] %v793_v16 }
 0xd40   :  { %1076 = shalt.err (!%p1073_p12)
}
 0xd41   :  { %s1077_s20 = scalar_lea.hbm %s1373_s10, 1024 }
 0xd42   :  { %p1078_p13 = scmp.ne.s32.totalorder %s1373_s10, %s1077_s20  ;;  %p1081_p0 = scmp.lt.u32.totalorder %s1077_s20, %s1373_s10 }
 0xd44   :  { %p1083_p1 = pnand %p1081_p0, %p1078_p13 }
 0xd46   :  { %1086 = shalt.err (!%p1083_p1)
}
 0xd47   :  { %s1096_s5 = smov 128   ;;  %s1097_s23 = smov 8  }
 0xd48   :  { %823 = dma.vmem_to_hbm [thread:$0]  %s818_s2, 1024, %s1373_s10, [#allocation5], %s1096_s5, %s1096_s5, %s1097_s23  }
 0xd49   :  { %1087 = dma.done.wait [#allocation5], 1024  }
 0xd4a   :  { %1088 = vsyncadd [#allocation5], 4294966272 }
 0xd4b   :  { %1089 = dma.done.wait [#allocation7], 128  }
 0xd4c   :  { %1090 = vsyncadd [#allocation7], 4294967168 }
 0xd4d   :  { %840 = vsyncpa [#allocation5], 1 }
 0xd4e   :  { %841 = vsyncpa [#allocation7], 1 }

</bundles_post_ra>
